<compile_context>
chip_gen: v6e
topology: v6e:2x2x1
jax: 0.10.0
libtpu: 0.0.40
codegen_flags: <defaults>
</compile_context>

<pallas_src>
import functools

import jax
import jax.numpy as jnp
from jax.experimental import pallas as pl
from jax.experimental.pallas import tpu as pltpu


# ----------------------------------------------------------------------------
# Helpers
# ----------------------------------------------------------------------------
def _round_up(x, m):
    return ((x + m - 1) // m) * m


def _vmem_capacity_bytes():
    """Per-core VMEM capacity; conservative fallback works on all generations."""
    try:
        return int(pltpu.get_tpu_info().vmem_capacity_bytes)
    except Exception:
        return 64 * 1024 * 1024  # v7x per-TC floor; safe everywhere


def _choose_tile_and_vmem(M, Kp, Ep, in_bytes, out_bytes):
    """Pick the row tile tm and an explicit VMEM limit from the HW budget."""
    cap = _vmem_capacity_bytes()
    tile_budget = cap // 2  # leave headroom for compiler scratch / pipelining
    # Resident weight + bias (double-buffered by the pipeliner) + per-row tiles.
    fixed = 2 * Kp * Ep * in_bytes + 2 * 8 * Ep * 4
    per_row = 2 * (Kp * in_bytes + Ep * out_bytes)  # double-buffered in + out
    tm_max = max(8, (tile_budget - fixed) // per_row)
    tm_max = max(8, min((int(tm_max) // 8) * 8, 4096))
    # Keep at least two grid blocks so both TensorCores are used on v7x.
    tm = min(tm_max, _round_up(pl.cdiv(M, 2), 8)) if M > 8 else 8
    tm = max(tm, 8)
    need = fixed + per_row * tm
    vmem_limit = int(min(cap * 0.8, need + (8 << 20)))
    vmem_limit = max(vmem_limit, 16 << 20)
    return tm, vmem_limit


# ----------------------------------------------------------------------------
# Pallas kernel: (tm, Kp) patch tile  @  (Kp, Ep) projection  +  (1, Ep) bias
# ----------------------------------------------------------------------------
def _patch_embed_kernel(p_ref, w_ref, b_ref, o_ref):
    acc = jnp.dot(p_ref[...], w_ref[...], preferred_element_type=jnp.float32)
    o_ref[...] = (acc + b_ref[...]).astype(o_ref.dtype)


def _patch_embed_matmul(patches, w_kxe, bias2d, *, tm, out_dtype, vmem_limit):
    """patches: (Mp, Kp), w_kxe: (Kp, Ep), bias2d: (1, Ep) f32 -> (Mp, Ep)."""
    Mp, Kp = patches.shape
    Ep = w_kxe.shape[1]
    assert Mp % tm == 0  # wrapper pads M up to the tile

    return pl.pallas_call(
        _patch_embed_kernel,
        out_shape=jax.ShapeDtypeStruct((Mp, Ep), out_dtype),
        grid_spec=pltpu.PrefetchScalarGridSpec(
            num_scalar_prefetch=0,
            grid=(Mp // tm,),
            in_specs=[
                pl.BlockSpec((tm, Kp), lambda i: (i, 0)),
                # Weight/bias are resident (same block every step); their
                # double-buffer cost is a few hundred KB and is negligible
                # next to the row tiles, so no custom pipeline_mode is needed.
                pl.BlockSpec((Kp, Ep), lambda i: (0, 0)),
                pl.BlockSpec((1, Ep), lambda i: (0, 0)),
            ],
            out_specs=pl.BlockSpec((tm, Ep), lambda i: (i, 0)),
        ),
        compiler_params=pltpu.CompilerParams(
            dimension_semantics=("parallel",),
            vmem_limit_bytes=vmem_limit,
        ),
    )(patches, w_kxe, bias2d)


# ----------------------------------------------------------------------------
# Forward (jitted so XLA fuses pad / transpose / cast into one input pass)
# ----------------------------------------------------------------------------
@functools.partial(
    jax.jit,
    static_argnames=("patch_size", "embed_dim", "flatten", "compute_dtype"),
)
def _forward(x, weight, bias, *, patch_size, embed_dim, flatten, compute_dtype):
    B, C, D, H, W = x.shape
    pd, ph, pw = patch_size

    # Right-side spatial padding, mirroring the F.pad calls in PyTorch forward.
    pad_w = (pw - W % pw) % pw
    pad_h = (ph - H % ph) % ph
    pad_d = (pd - D % pd) % pd
    if pad_w or pad_h or pad_d:
        x = jnp.pad(x, ((0, 0), (0, 0), (0, pad_d), (0, pad_h), (0, pad_w)))
    Dp, Hp, Wp = (D + pad_d) // pd, (H + pad_h) // ph, (W + pad_w) // pw

    K = C * pd * ph * pw
    E = embed_dim
    N = Dp * Hp * Wp
    M = B * N

    # Lane-dense padding of contraction (K) and embedding (E) dims.
    Kp = _round_up(K, 128)
    Ep = _round_up(E, 128)

    # im2col: (B,C,Dp,pd,Hp,ph,Wp,pw) -> (B,Dp,Hp,Wp,C,pd,ph,pw) -> (M, K)
    # TODO(synk): fold patch extraction into the kernel (pl.ANY + strided DMA)
    # to avoid the wrapper-side transpose pass over the input tensor.
    xp = x.reshape(B, C, Dp, pd, Hp, ph, Wp, pw)
    xp = xp.transpose(0, 2, 4, 6, 1, 3, 5, 7)
    patches = xp.reshape(M, K).astype(compute_dtype)

    in_bytes = jnp.dtype(compute_dtype).itemsize
    out_dtype = x.dtype
    out_bytes = jnp.dtype(out_dtype).itemsize
    tm, vmem_limit = _choose_tile_and_vmem(M, Kp, Ep, in_bytes, out_bytes)
    Mp = _round_up(M, tm)

    if Kp != K or Mp != M:
        patches = jnp.pad(patches, ((0, Mp - M), (0, Kp - K)))

    # Conv weight (E, C, pd, ph, pw) -> (K, E) with matching feature order.
    w_kxe = weight.reshape(E, K).T.astype(compute_dtype)
    if Kp != K or Ep != E:
        w_kxe = jnp.pad(w_kxe, ((0, Kp - K), (0, Ep - E)))

    bias_f32 = bias.astype(jnp.float32)
    if Ep != E:
        bias_f32 = jnp.pad(bias_f32, (0, Ep - E))
    bias2d = bias_f32.reshape(1, Ep)

    out = _patch_embed_matmul(
        patches, w_kxe, bias2d, tm=tm, out_dtype=out_dtype, vmem_limit=vmem_limit
    )
    out = out[:M, :E]

    if flatten:
        # (B, N, E) — matches x.flatten(2).transpose(1, 2) on (B,E,Dp,Hp,Wp)
        return out.reshape(B, N, E)
    # Un-flattened conv output layout (B, E, Dp, Hp, Wp)
    return out.reshape(B, Dp, Hp, Wp, E).transpose(0, 4, 1, 2, 3)


# ----------------------------------------------------------------------------
# Module wrapper
# ----------------------------------------------------------------------------
class OpenSoraPatchEmbed3D:
    """JAX/Pallas port of videosys OpenSoraPatchEmbed3D (norm_layer=None)."""

    def __init__(self, patch_size=(2, 4, 4), in_chans=3, embed_dim=96,
                 norm_layer=None, flatten=True, key=None, dtype=jnp.float32,
                 compute_dtype=jnp.bfloat16):
        # TODO(synk): norm_layer is not implemented (module default is None).
        assert norm_layer is None, "norm_layer not supported in Pallas port"
        self.patch_size = tuple(patch_size)
        self.in_chans = in_chans
        self.embed_dim = embed_dim
        self.flatten = flatten
        self.compute_dtype = compute_dtype
        if key is None:
            key = jax.random.PRNGKey(0)
        kw, kb = jax.random.split(key)
        pd, ph, pw = self.patch_size
        fan_in = in_chans * pd * ph * pw
        bound = 1.0 / (fan_in ** 0.5)
        # Conv3d weight: (embed_dim, in_chans, pd, ph, pw); bias: (embed_dim,)
        self.weight = jax.random.uniform(
            kw, (embed_dim, in_chans, pd, ph, pw), dtype, -bound, bound)
        self.bias = jax.random.uniform(kb, (embed_dim,), dtype, -bound, bound)

    def __call__(self, x):
        return _forward(
            x, self.weight, self.bias,
            patch_size=self.patch_size,
            embed_dim=self.embed_dim,
            flatten=self.flatten,
            compute_dtype=self.compute_dtype,
        )


# ----------------------------------------------------------------------------
# Pure-JAX reference (lax conv, f32) for verification
# ----------------------------------------------------------------------------
def _reference(x, weight, bias, patch_size):
    pd, ph, pw = patch_size
    B, C, D, H, W = x.shape
    pad = ((0, (pd - D % pd) % pd), (0, (ph - H % ph) % ph), (0, (pw - W % pw) % pw))
    y = jax.lax.conv_general_dilated(
        x, weight, window_strides=patch_size, padding=pad,
        dimension_numbers=("NCDHW", "OIDHW", "NCDHW"))
    y = y + bias.reshape(1, -1, 1, 1, 1)
    B_, E, Dp, Hp, Wp = y.shape
    return y.reshape(B_, E, Dp * Hp * Wp).transpose(0, 2, 1)


if __name__ == "__main__":
    key = jax.random.PRNGKey(0)
    k_x, k_p = jax.random.split(key)

    # Small shapes (module defaults: in_chans=3, embed_dim=96, patch=(2,4,4)).
    # D/H/W chosen non-divisible to exercise the spatial-pad path; K=96 and
    # E=96 exercise the 128-lane padding path; M=150 exercises M-tile padding.
    B, C, D, H, W = 2, 3, 5, 18, 18
    patch_size = (2, 4, 4)
    embed_dim = 96

    x = jax.random.normal(k_x, (B, C, D, H, W), jnp.float32)

    module = OpenSoraPatchEmbed3D(patch_size=patch_size, in_chans=C,
                                  embed_dim=embed_dim, key=k_p)

    out = jax.block_until_ready(module(x))

    ref = _reference(x, module.weight, module.bias, patch_size)
    Dp, Hp, Wp = -(-D // 2), -(-H // 4), -(-W // 4)
    assert out.shape == ref.shape == (B, Dp * Hp * Wp, embed_dim), (out.shape, ref.shape)
    # bf16 operands with f32 accumulation -> loosened tolerance vs f32 conv ref.
    assert jnp.allclose(out, ref, atol=2e-2, rtol=2e-2), "mismatch vs reference"

    print("KERNEL_OK")
</pallas_src>

<mosaic_0001>
module attributes {stable_mosaic.version = 11 : i64} {
  func.func @_patch_embed_kernel(%arg0: i32, %arg1: memref<80x128xbf16, #tpu.memory_space<vmem>>, %arg2: memref<128x128xbf16, #tpu.memory_space<vmem>>, %arg3: memref<1x128xf32, #tpu.memory_space<vmem>>, %arg4: memref<80x128xf32, #tpu.memory_space<vmem>>) attributes {dimension_semantics = [#tpu.dimension_semantics<parallel>], iteration_bounds = array<i64: 2>, scalar_prefetch = 0 : i64, scratch_operands = 0 : i64, tpu.core_type = #tpu.core_type<tc>, window_params = [{transform_indices = @transform_0, window_bounds = array<i64: 80, 128>}, {pipeline_mode = #tpu.pipeline_mode<synchronous>, transform_indices = @transform_1, window_bounds = array<i64: 128, 128>}, {pipeline_mode = #tpu.pipeline_mode<synchronous>, transform_indices = @transform_2, window_bounds = array<i64: 1, 128>}, {transform_indices = @transform_3, window_bounds = array<i64: 80, 128>}]} {
    %c0 = arith.constant 0 : index
    %c0_0 = arith.constant 0 : index
    %0 = vector.load %arg1[%c0, %c0_0] : memref<80x128xbf16, #tpu.memory_space<vmem>>, vector<80x128xbf16>
    %c0_1 = arith.constant 0 : index
    %c0_2 = arith.constant 0 : index
    %1 = vector.load %arg2[%c0_1, %c0_2] : memref<128x128xbf16, #tpu.memory_space<vmem>>, vector<128x128xbf16>
    %cst = arith.constant dense<0.000000e+00> : vector<80x128xf32>
    %2 = tpu.matmul %0, %1, %cst {dimension_numbers = #tpu.dot_dimension_numbers<[1], [0], [0], [1], [0, 0, 1, 1], [], []>} : vector<80x128xbf16>, vector<128x128xbf16>, vector<80x128xf32> -> vector<80x128xf32>
    %c0_3 = arith.constant 0 : index
    %c0_4 = arith.constant 0 : index
    %3 = vector.load %arg3[%c0_3, %c0_4] : memref<1x128xf32, #tpu.memory_space<vmem>>, vector<1x128xf32>
    %4 = vector.broadcast %3 : vector<1x128xf32> to vector<80x128xf32>
    %5 = arith.addf %2, %4 : vector<80x128xf32>
    %c0_5 = arith.constant 0 : index
    %c0_6 = arith.constant 0 : index
    %6 = vector.load %arg4[%c0_5, %c0_6] : memref<80x128xf32, #tpu.memory_space<vmem>>, vector<80x128xf32>
    tpu.vector_store %arg4[%c0_5, %c0_6], %5 {strides = array<i32>} : memref<80x128xf32, #tpu.memory_space<vmem>>, vector<80x128xf32>,
    return
  }
  func.func @transform_0(%arg0: i32) -> (i32, i32) {
    %c0_i32 = arith.constant 0 : i32
    %c0_i32_0 = arith.constant 0 : i32
    return %arg0, %c0_i32 : i32, i32
  }
  func.func @transform_1(%arg0: i32) -> (i32, i32) {
    %c0_i32 = arith.constant 0 : i32
    %c0_i32_0 = arith.constant 0 : i32
    %c0_i32_1 = arith.constant 0 : i32
    return %c0_i32, %c0_i32_0 : i32, i32
  }
  func.func @transform_2(%arg0: i32) -> (i32, i32) {
    %c0_i32 = arith.constant 0 : i32
    %c0_i32_0 = arith.constant 0 : i32
    %c0_i32_1 = arith.constant 0 : i32
    return %c0_i32, %c0_i32_0 : i32, i32
  }
  func.func @transform_3(%arg0: i32) -> (i32, i32) {
    %c0_i32 = arith.constant 0 : i32
    %c0_i32_0 = arith.constant 0 : i32
    return %arg0, %c0_i32 : i32, i32
  }
}

</mosaic_0001>

<bundles_post_ra>
// kernel: _forward.1
= control target key start
LH: loop header
LB: loop body
LE: loop exit
PB: predicated region body
PF: predicated region fallthrough
CT: control target
= control target key end

     0   :  { %s566_s12 = smov 0   ;;  %s638_s0 = inlined_call_operand.vmem [shape: bf16[160,128], index: 0, kind: input, shape index: {}]   ;;  %s639_s1 = inlined_call_operand.vmem [shape: bf16[128,128], index: 1, kind: input, shape index: {}]   ;;  %s640_s2 = inlined_call_operand.vmem [shape: f32[1,128], index: 2, kind: input, shape index: {}]   ;;  %s641_s3 = inlined_call_operand.vmem [shape: f32[160,128], index: 3, kind: output, shape index: {}]  }
   0x1 LB: > { %s425_s13 = sadd.s32 4294967295, %s542_s12   ;;  %p429_p0 = scmp.ge.s32.totalorder %s542_s12, 1  ;;  %s542_s12 = sphi %s566_s12, %s13_s12  }
   0x2   : > { %p138_p1 = scmp.lt.s32.totalorder %s542_s12, 3 }
   0x4   : > { %p139_p2 = pnand %p429_p0, %p138_p1 }
   0x5   : > { %s162_s18 = smul.u32 (!%p139_p2), 10, %s425_s13 }
   0x6   : > { %142 = sbr.rel (%p139_p2) target bundleno = 260 (0x104), region = 32 }
   0x7   : > { %p163_p3 = scmp.lt.s32.totalorder (!%p139_p2), %s162_s18, 19 }
   0xb   : > { %v523_v0 = vld [vmem:[%s639_s1 + $0x38] sm:$0xff]   ;;  %v544_v1 = vmov 0.0   ;;  %v524_v2 = vld [vmem:[%s639_s1 + $0x30] sm:$0xff]   ;;  %vm545_vm0 = vmmov 0   ;;  %v525_v3 = vld [vmem:[%s639_s1 + $0x28] sm:$0xff]   ;;  %s643_s18 = smov (!%p163_p3, %s162_s18), 19 }
   0xc   : > { %461 = vmatprep.subr.bf16.mxu0 %v544_v1  ;;  %497 = vmatprep.subr.bf16.mxu1 %v544_v1  ;;  %s430_s21 = sshll.u32 %s643_s18, 2  ;;  %v526_v4 = vld [vmem:[%s639_s1 + $0x20] sm:$0xff]   ;;  %v527_v5 = vld [vmem:[%s639_s1 + $0x18] sm:$0xff]   ;;  %v528_v6 = vld [vmem:[%s639_s1 + $0x10] sm:$0xff]   ;;  %s431_s8 = sshll.u32 %s643_s18, 3 }
   0xd   : > { %462 = vmatpush3.bf16.msra.mxu0 %v523_v0  ;;  %505 = vmatpush3.bf16.msra.mxu1 %v523_v0  ;;  %s591_s24 = scalar_lea.vmem %s638_s0, %s430_s21  ;;  %v529_v7 = vld [vmem:[%s639_s1 + $0x8] sm:$0xff]   ;;  %v530_v8 = vld [vmem:[%s639_s1] sm:$0xff]   ;;  %s623_s14 = scalar_lea.vmem %s641_s3, %s431_s8 }
   0xe   : > { %463 = vmatprep.subr.bf16.mxu0 %v544_v1  ;;  %498 = vmatprep.subr.bf16.mxu1 %v544_v1  ;;  %v531_v9 = vld [vmem:[%s591_s24] sm:$0xff]   ;;  %v532_v10 = vld [vmem:[%s591_s24 + $0x18] sm:$0xff]   ;;  %v533_v11 = vld [vmem:[%s591_s24 + $0x8] sm:$0xff]  }
   0xf   : > { %477 = vmatprep.mubr.msk.bf16.mxu0 %vm545_vm0, %v544_v1  ;;  %489 = vmatprep.mubr.msk.bf16.mxu1 %vm545_vm0, %v544_v1  ;;  %v534_v12 = vld [vmem:[%s591_s24 + $0x20] sm:$0xff]   ;;  %v535_v13 = vld [vmem:[%s591_s24 + $0x10] sm:$0xff]  }
  0x10   : > { %v432_v14 = vld [vmem:[%s640_s2] ss:$0 sm:$0xff] }
  0x11   : > { %464 = vmatpush3.bf16.msra.mxu0 %v524_v2  ;;  %506 = vmatpush3.bf16.msra.mxu1 %v524_v2 }
  0x12   : > { %465 = vmatprep.subr.bf16.mxu0 %v544_v1  ;;  %499 = vmatprep.subr.bf16.mxu1 %v544_v1 }
  0x15   : > { %466 = vmatpush3.bf16.msra.mxu0 %v525_v3  ;;  %507 = vmatpush3.bf16.msra.mxu1 %v525_v3 }
  0x16   : > { %467 = vmatprep.subr.bf16.mxu0 %v544_v1  ;;  %500 = vmatprep.subr.bf16.mxu1 %v544_v1 }
  0x19   : > { %468 = vmatpush3.bf16.msra.mxu0 %v526_v4  ;;  %508 = vmatpush3.bf16.msra.mxu1 %v526_v4 }
  0x1a   : > { %469 = vmatprep.subr.bf16.mxu0 %v544_v1  ;;  %501 = vmatprep.subr.bf16.mxu1 %v544_v1 }
  0x1d   : > { %470 = vmatpush3.bf16.msra.mxu0 %v527_v5  ;;  %509 = vmatpush3.bf16.msra.mxu1 %v527_v5 }
  0x1e   : > { %471 = vmatprep.subr.bf16.mxu0 %v544_v1  ;;  %502 = vmatprep.subr.bf16.mxu1 %v544_v1 }
  0x21   : > { %472 = vmatpush3.bf16.msra.mxu0 %v528_v6  ;;  %510 = vmatpush3.bf16.msra.mxu1 %v528_v6 }
  0x22   : > { %473 = vmatprep.subr.bf16.mxu0 %v544_v1  ;;  %503 = vmatprep.subr.bf16.mxu1 %v544_v1 }
  0x25   : > { %474 = vmatpush3.bf16.msra.mxu0 %v529_v7  ;;  %511 = vmatpush3.bf16.msra.mxu1 %v529_v7 }
  0x26   : > { %475 = vmatprep.subr.bf16.mxu0 %v544_v1  ;;  %504 = vmatprep.subr.bf16.mxu1 %v544_v1 }
  0x29   : > { %476 = vmatpush3.bf16.msra.mxu0 %v530_v8  ;;  %512 = vmatpush3.bf16.msra.mxu1 %v530_v8 }
  0x2c   : > { %478 = vmatmul.mubr.bf16.vlgmr.msra.gmra.mxu0 %v531_v9  ;;  %490 = vmatmul.mubr.bf16.vlgmr.msra.gmra.mxu1 %v532_v10 }
  0x2d   : > { %481 = vmatprep.mubr.msk.bf16.mxu0 %vm545_vm0, %v544_v1  ;;  %493 = vmatprep.mubr.msk.bf16.mxu1 %vm545_vm0, %v544_v1 }
  0x34   : > { %482 = vmatmul.mubr.bf16.gmra.mxu0 %v533_v11  ;;  %494 = vmatmul.mubr.bf16.gmra.mxu1 %v534_v12 }
  0x35   : > { %485 = vmatprep.mubr.msk.bf16.mxu0 %vm545_vm0, %v544_v1 }
  0x3c   : > { %486 = vmatmul.mubr.bf16.gmra.mxu0 %v535_v13 }
  0xec   : > { %v320_v15 = vpop.f32.mrf.mxu0  ;;  %v344_v16 = vpop.f32.mrf.mxu1 }
  0xed   : > { %v321_v17 = vadd.f32 %v432_v14, %v320_v15  ;;  %v345_v18 = vadd.f32 %v432_v14, %v344_v16 }
  0xee   : > { %v479_v19 = vpop.f32.mrf.mxu0  ;;  %v491_v20 = vpop.f32.mrf.mxu1 }
  0xef   : > { %359 = vst [vmem:[%s623_s14] sm:$0xff] %v321_v17  ;;  %365 = vst [vmem:[%s623_s14 + $0x30] sm:$0xff] %v345_v18 }
  0xf0   : > { %v323_v21 = vpop.f32.mrf.mxu0  ;;  %v347_v22 = vpop.f32.mrf.mxu1 }
  0xf1   : > { %v324_v23 = vadd.f32 %v432_v14, %v323_v21  ;;  %v348_v24 = vadd.f32 %v432_v14, %v347_v22 }
  0xf2   : > { %v480_v25 = vpop.f32.mrf.mxu0  ;;  %v492_v26 = vpop.f32.mrf.mxu1 }
  0xf3   : > { %360 = vst [vmem:[%s623_s14 + $0x8] sm:$0xff] %v324_v23  ;;  %366 = vst [vmem:[%s623_s14 + $0x38] sm:$0xff] %v348_v24 }
  0xf4   : > { %v328_v27 = vpop.f32.mrf.mxu0  ;;  %v352_v28 = vpop.f32.mrf.mxu1 }
  0xf5   : > { %v329_v29 = vadd.f32 %v432_v14, %v328_v27  ;;  %v353_v30 = vadd.f32 %v432_v14, %v352_v28 }
  0xf6   : > { %v483_v31 = vpop.f32.mrf.mxu0  ;;  %v495_v32 = vpop.f32.mrf.mxu1 }
  0xf7   : > { %361 = vst [vmem:[%s623_s14 + $0x10] sm:$0xff] %v329_v29  ;;  %367 = vst [vmem:[%s623_s14 + $0x40] sm:$0xff] %v353_v30 }
  0xf8   : > { %v331_v33 = vpop.f32.mrf.mxu0  ;;  %v355_v34 = vpop.f32.mrf.mxu1 }
  0xf9   : > { %v332_v35 = vadd.f32 %v432_v14, %v331_v33  ;;  %v356_v36 = vadd.f32 %v432_v14, %v355_v34 }
  0xfa   : > { %v484_v37 = vpop.f32.mrf.mxu0  ;;  %v496_v38 = vpop.f32.mrf.mxu1 }
  0xfb   : > { %362 = vst [vmem:[%s623_s14 + $0x18] sm:$0xff] %v332_v35  ;;  %368 = vst [vmem:[%s623_s14 + $0x48] sm:$0xff] %v356_v36 }
  0xfc   : > { %v336_v39 = vpop.f32.mrf.mxu0 }
  0xfd   : > { %v337_v40 = vadd.f32 %v432_v14, %v336_v39 }
  0xfe   : > { %v487_v41 = vpop.f32.mrf.mxu0 }
  0xff   : > { %363 = vst [vmem:[%s623_s14 + $0x20] sm:$0xff] %v337_v40 }
 0x100   : > { %v339_v42 = vpop.f32.mrf.mxu0 }
 0x101   : > { %v340_v43 = vadd.f32 %v432_v14, %v339_v42 }
 0x102   : > { %v488_v44 = vpop.f32.mrf.mxu0 }
 0x103   : > { %364 = vst [vmem:[%s623_s14 + $0x28] sm:$0xff] %v340_v43 }
 0x104 PF: > { %s13_s12 = sadd.s32 1, %s542_s12  }
 0x105   : > { %p10_p4 = scmp.ge.s32.totalorder %s13_s12, 4  }
 0x107   :  { %12 = sbr.rel (!%p10_p4) target bundleno = 1 (0x1), region = 62 }

</bundles_post_ra>
